<compile_context>
chip_gen: v7x
topology: tpu7x:2x2x1
jax: 0.10.0
libtpu: 0.0.40
codegen_flags: <defaults>
</compile_context>

<pallas_src>
import jax
import jax.numpy as jnp
from jax import lax
from jax.experimental import pallas as pl
from jax.experimental.pallas import tpu as pltpu
import numpy as np


def lr_kernel(idx_ref, w_ref, bias_ref, out_ref):
    # idx_ref : (F, TB)  int32   (field offsets already added; batch on lanes)
    # w_ref   : (Vp, 1)  float32 (zero-padded embedding column, embed_dim=1)
    # bias_ref: (1,)     float32 in SMEM
    # out_ref : (1, TB)  float32 (lane-dense output tile)
    idx = idx_ref[...]                       # (F, TB)
    w = w_ref[...]                           # (Vp, 1)
    nf, tb = idx.shape
    vp = w.shape[0]

    # Vocab iota built exactly once (hoisted out of the per-field loop).
    iota_v = lax.broadcasted_iota(jnp.int32, (vp, tb), 0)

    # Accumulate F 2-D compares -> per-sample vocab counts (duplicates add up,
    # matching the embedding-sum semantics).
    counts = jnp.zeros((vp, tb), jnp.float32)
    for f in range(nf):                      # nf is small & static: unrolled
        counts = counts + (idx[f:f + 1, :] == iota_v).astype(jnp.float32)

    # Weighted sum over the vocab: VPU multiply + sublane reduce (no MXU
    # needed at embed_dim == 1).  Result is already lane-dense (1, TB).
    s = jnp.sum(counts * w, axis=0, keepdims=True)      # (1, TB)
    out_ref[...] = jax.nn.sigmoid(s + bias_ref[0])


def _round_up(n, m):
    return (n + m - 1) // m * m


def lr_forward(x_idx, weight, bias, *, tb=128):
    """x_idx: (B, F) int32 indices with field offsets applied;
    weight: (V, 1) float32 embedding table; bias: (1,) float32."""
    B, F = x_idx.shape
    V = weight.shape[0]

    Vp = _round_up(V, 128)        # padded rows carry zero weight, never hit
    Bp = _round_up(B, tb)         # padded samples point at row 0, sliced off
    n_tiles = Bp // tb

    # Batch on the lane axis: (F, Bp) indices.
    x_t = jnp.zeros((F, Bp), jnp.int32).at[:, :B].set(
        x_idx.astype(jnp.int32).T)
    w_pad = jnp.zeros((Vp, 1), jnp.float32).at[:V, :].set(
        weight.astype(jnp.float32))

    out = pl.pallas_call(
        lr_kernel,
        out_shape=jax.ShapeDtypeStruct((1, Bp), jnp.float32),
        grid=(n_tiles,),
        in_specs=[
            pl.BlockSpec((F, tb), lambda i: (0, i)),     # index tile
            pl.BlockSpec((Vp, 1), lambda i: (0, 0)),     # resident weight col
            pl.BlockSpec(memory_space=pltpu.SMEM),       # bias scalar
        ],
        out_specs=pl.BlockSpec((1, tb), lambda i: (0, i)),
        compiler_params=pltpu.CompilerParams(
            dimension_semantics=("parallel",)),
    )(x_t, w_pad, bias.astype(jnp.float32))

    return out[0, :B][:, None]    # (B, 1)


if __name__ == "__main__":
    # Deterministic synthetic setup (mirrors LR.__init__(feature_nums)).
    feature_nums = (8, 16, 12)               # 3 categorical fields
    offsets = np.array((0, *np.cumsum(feature_nums)[:-1]), dtype=np.int32)
    vocab = int(sum(feature_nums))           # 36
    B, F = 8, len(feature_nums)

    key = jax.random.PRNGKey(0)
    k_w, *k_x = jax.random.split(key, 1 + F)

    # Embedding(sum(feature_nums), 1) weight; bias initialized to zeros.
    weight = jax.random.normal(k_w, (vocab, 1), jnp.float32) * 0.1
    bias = jnp.zeros((1,), jnp.float32)

    # x: (B, F) per-field categorical indices (PyTorch passes raw field indices).
    cols = [jax.random.randint(k_x[f], (B,), 0, feature_nums[f], jnp.int32)
            for f in range(F)]
    x = jnp.stack(cols, axis=1)              # (B, F)

    # Glue: add field offsets (FeatureEmbedding does x + offsets before lookup).
    x_off = x + jnp.asarray(offsets)[None, :]

    out = lr_forward(x_off, weight, bias)
    out = jax.block_until_ready(out)

    # Pure-JAX reference check.
    ref = jax.nn.sigmoid(
        jnp.take(weight[:, 0], x_off, axis=0).sum(axis=1, keepdims=True)
        + bias)
    assert out.shape == (B, 1)
    np.testing.assert_allclose(np.asarray(out), np.asarray(ref),
                               rtol=1e-5, atol=1e-5)
    print("KERNEL_OK")
</pallas_src>

<mosaic_0001>
module attributes {stable_mosaic.version = 11 : i64} {
  func.func @lr_kernel(%arg0: i32, %arg1: memref<3x128xi32, #tpu.memory_space<vmem>>, %arg2: memref<128x1xf32, #tpu.memory_space<vmem>>, %arg3: memref<1xf32, #tpu.memory_space<smem>>, %arg4: memref<1x128xf32, #tpu.memory_space<vmem>>) attributes {dimension_semantics = [#tpu.dimension_semantics<parallel>], iteration_bounds = array<i64: 1>, scalar_prefetch = 0 : i64, scratch_operands = 0 : i64, tpu.core_type = #tpu.core_type<tc>, window_params = [{transform_indices = @transform_0, window_bounds = array<i64: 3, 128>}, {pipeline_mode = #tpu.pipeline_mode<synchronous>, transform_indices = @transform_1, window_bounds = array<i64: 128, 1>}, {transform_indices = @transform_2, window_bounds = array<i64: 1>}, {transform_indices = @transform_3, window_bounds = array<i64: 1, 128>}]} {
    %c0 = arith.constant 0 : index
    %c0_0 = arith.constant 0 : index
    %0 = vector.load %arg1[%c0, %c0_0] : memref<3x128xi32, #tpu.memory_space<vmem>>, vector<3x128xi32>
    %c0_1 = arith.constant 0 : index
    %c0_2 = arith.constant 0 : index
    %1 = vector.load %arg2[%c0_1, %c0_2] : memref<128x1xf32, #tpu.memory_space<vmem>>, vector<128x1xf32>
    %2 = tpu.iota {dimensions = array<i32: 0>} : vector<128x128xi32>
    %cst = arith.constant 0.000000e+00 : f32
    %3 = vector.broadcast %cst : f32 to vector<128x128xf32>
    %4 = vector.extract_strided_slice %0 {offsets = [0, 0], sizes = [1, 128], strides = [1, 1]} : vector<3x128xi32> to vector<1x128xi32>
    %5 = vector.broadcast %4 : vector<1x128xi32> to vector<128x128xi32>
    %6 = arith.cmpi eq, %5, %2 : vector<128x128xi32>
    %7 = arith.extui %6 : vector<128x128xi1> to vector<128x128xi32>
    %8 = arith.sitofp %7 : vector<128x128xi32> to vector<128x128xf32>
    %9 = arith.addf %3, %8 : vector<128x128xf32>
    %10 = vector.extract_strided_slice %0 {offsets = [1, 0], sizes = [1, 128], strides = [1, 1]} : vector<3x128xi32> to vector<1x128xi32>
    %11 = vector.broadcast %10 : vector<1x128xi32> to vector<128x128xi32>
    %12 = arith.cmpi eq, %11, %2 : vector<128x128xi32>
    %13 = arith.extui %12 : vector<128x128xi1> to vector<128x128xi32>
    %14 = arith.sitofp %13 : vector<128x128xi32> to vector<128x128xf32>
    %15 = arith.addf %9, %14 : vector<128x128xf32>
    %16 = vector.extract_strided_slice %0 {offsets = [2, 0], sizes = [1, 128], strides = [1, 1]} : vector<3x128xi32> to vector<1x128xi32>
    %17 = vector.broadcast %16 : vector<1x128xi32> to vector<128x128xi32>
    %18 = arith.cmpi eq, %17, %2 : vector<128x128xi32>
    %19 = arith.extui %18 : vector<128x128xi1> to vector<128x128xi32>
    %20 = arith.sitofp %19 : vector<128x128xi32> to vector<128x128xf32>
    %21 = arith.addf %15, %20 : vector<128x128xf32>
    %22 = vector.broadcast %1 : vector<128x1xf32> to vector<128x128xf32>
    %23 = arith.mulf %21, %22 : vector<128x128xf32>
    %cst_3 = arith.constant dense<0.000000e+00> : vector<128xf32>
    %24 = vector.multi_reduction <add>, %23, %cst_3 [0] : vector<128x128xf32> to vector<128xf32>
    %25 = vector.shape_cast %24 : vector<128xf32> to vector<1x128xf32>
    %c0_4 = arith.constant 0 : index
    %26 = memref.load %arg3[%c0_4] : memref<1xf32, #tpu.memory_space<smem>>
    %27 = vector.broadcast %26 : f32 to vector<1x128xf32>
    %28 = arith.addf %25, %27 : vector<1x128xf32>
    %29 = arith.negf %28 : vector<1x128xf32>
    %30 = math.exp %29 : vector<1x128xf32>
    %cst_5 = arith.constant 1.000000e+00 : f32
    %31 = vector.broadcast %cst_5 : f32 to vector<1x128xf32>
    %32 = arith.addf %31, %30 : vector<1x128xf32>
    %33 = arith.divf %31, %32 : vector<1x128xf32>
    %c0_6 = arith.constant 0 : index
    %c0_7 = arith.constant 0 : index
    %34 = vector.load %arg4[%c0_6, %c0_7] : memref<1x128xf32, #tpu.memory_space<vmem>>, vector<1x128xf32>
    tpu.vector_store %arg4[%c0_6, %c0_7], %33 {strides = array<i32>} : memref<1x128xf32, #tpu.memory_space<vmem>>, vector<1x128xf32>,
    return
  }
  func.func @transform_0(%arg0: i32) -> (i32, i32) {
    %c0_i32 = arith.constant 0 : i32
    %c0_i32_0 = arith.constant 0 : i32
    return %c0_i32, %arg0 : i32, i32
  }
  func.func @transform_1(%arg0: i32) -> (i32, i32) {
    %c0_i32 = arith.constant 0 : i32
    %c0_i32_0 = arith.constant 0 : i32
    %c0_i32_1 = arith.constant 0 : i32
    return %c0_i32, %c0_i32_0 : i32, i32
  }
  func.func @transform_2(%arg0: i32) -> i32 {
    %c0_i32 = arith.constant 0 : i32
    %c0_i32_0 = arith.constant 0 : i32
    return %c0_i32 : i32
  }
  func.func @transform_3(%arg0: i32) -> (i32, i32) {
    %c0_i32 = arith.constant 0 : i32
    %c0_i32_0 = arith.constant 0 : i32
    return %c0_i32, %arg0 : i32, i32
  }
}

</mosaic_0001>

<bundles_post_ra>
// kernel: tpu_custom_call.1
= control target key start
LH: loop header
LB: loop body
LE: loop exit
PB: predicated region body
PF: predicated region fallthrough
CT: control target
= control target key end

     0   :  { %v477_v2 = vmov 0   ;;  %s701_s0 = inlined_call_operand.vmem [shape: s32[3,128], index: 0, kind: input, shape index: {}]   ;;  %s702_s1 = inlined_call_operand.vmem [shape: f32[128,1], index: 1, kind: input, shape index: {}]   ;;  %s703_s2 = inlined_call_operand.<no memory space> [shape: f32[1], index: 2, kind: input, shape index: {}]   ;;  %s704_s3 = inlined_call_operand.hbm [shape: f32[1,128], index: 3, kind: output, shape index: {}]  }
   0x1   :  { %v19_v0 = vld [vmem:[%s702_s1 + $0x10] sm:$0xff]  ;;  %v17_v1 = vld [vmem:[%s702_s1] sm:$0xff]  ;;  %448 = vset.pattern.permute.xlu1 %v477_v2  ;;  %447 = vset.pattern.permute.xlu0 %v477_v2  ;;  %v20_v3 = vld [vmem:[%s702_s1 + $0x18] sm:$0xff] }
   0x2   :  { %266 = vperm.xlu1 %448, %v19_v0   ;;  %256 = vperm.xlu0 %447, %v17_v1   ;;  %v18_v4 = vld [vmem:[%s702_s1 + $0x8] sm:$0xff] }
   0x6   :  { %271 = vperm.xlu1 %448, %v20_v3   ;;  %261 = vperm.xlu0 %447, %v18_v4  }
   0x7   :  { %9 = vsyncpa [#allocation4], 0  ;;  %v22_v5 = vld [vmem:[%s702_s1 + $0x28] sm:$0xff]  ;;  %v21_v6 = vld [vmem:[%s702_s1 + $0x20] sm:$0xff]  ;;  %v33_v17 = vlaneseq  ;;  %v478_v29 = vmov 0.0   ;;  %s479_s19 = smov [#allocation3]  }
   0x8   :  { %v24_v7 = vld [vmem:[%s702_s1 + $0x38] sm:$0xff]  ;;  %v23_v8 = vld [vmem:[%s702_s1 + $0x30] sm:$0xff]  ;;  %v26_v9 = vld [vmem:[%s702_s1 + $0x48] sm:$0xff]  ;;  %s387_s20 = sshll.u32 %s479_s19, 4  ;;  %s388_s20 = int_to_ptr.vmem [resolvable:$true] %s387_s20 }
   0x9   :  { %v25_v10 = vld [vmem:[%s702_s1 + $0x40] sm:$0xff]  ;;  %v28_v11 = vld [vmem:[%s702_s1 + $0x58] sm:$0xff]  ;;  %v27_v12 = vld [vmem:[%s702_s1 + $0x50] sm:$0xff]  ;;  %v548_v18 = vshrl.u32 %v33_v17, 7  ;;  %s453_s21 = scalar_lea.vmem %s388_s20, 16  ;;  %s457_s22 = scalar_lea.vmem %s388_s20, 32 }
   0xa   :  { %281 = vperm.xlu1 %448, %v22_v5   ;;  %276 = vperm.xlu0 %447, %v21_v6   ;;  %v30_v13 = vld [vmem:[%s702_s1 + $0x68] sm:$0xff]  ;;  %v29_v14 = vld [vmem:[%s702_s1 + $0x60] sm:$0xff]  ;;  %v32_v15 = vld [vmem:[%s702_s1 + $0x78] sm:$0xff]  ;;  %p454_p0 = scmp.ne.s32.totalorder %s388_s20, %s453_s21  ;;  %p458_p1 = scmp.lt.s32.totalorder %s388_s20, %s388_s20 }
   0xb   :  { %v31_v16 = vld [vmem:[%s702_s1 + $0x70] sm:$0xff]  ;;  %v52_v19 = vsub.s32 0, %v548_v18  ;;  %v120_v20 = vsub.s32 1, %v548_v18  ;;  %v16_v21 = vld [vmem:[%s701_s0] sm:$0x7]  ;;  %v188_v22 = vsub.s32 2, %v548_v18  ;;  %p459_p2 = scmp.lt.s32.totalorder %s457_s22, %s453_s21 }
   0xc   :  { %v36_v23 = vadd.s32 16, %v548_v18  ;;  %v37_v26 = vadd.s32 24, %v548_v18  ;;  %v35_v28 = vadd.s32 8, %v548_v18  ;;  %v39_v36 = vadd.s32 40, %v548_v18 }
   0xd   :  { %v557_v24 = vrot.slane %v16_v21, %v52_v19  ;;  %v559_v25 = vrot.slane %v16_v21, %v120_v20  ;;  %v562_v27 = vrot.slane %v16_v21, %v188_v22  ;;  %v38_v41 = vadd.s32 32, %v548_v18  ;;  %p460_p3 = por %p459_p2, %p458_p1 }
   0xe   :  { %291 = vperm.xlu1 %448, %v24_v7   ;;  %286 = vperm.xlu0 %447, %v23_v8   ;;  %v41_v42 = vadd.s32 56, %v548_v18  ;;  %v40_v45 = vadd.s32 48, %v548_v18  ;;  %v43_v55 = vadd.s32 72, %v548_v18  ;;  %v42_v60 = vadd.s32 64, %v548_v18 }
   0xf   :  { %vm56_vm0 = vcmp.eq.s32.totalorder %v557_v24, %v36_v23  ;;  %vm124_vm1 = vcmp.eq.s32.totalorder %v559_v25, %v36_v23  ;;  %vm54_vm2 = vcmp.eq.s32.totalorder %v557_v24, %v548_v18  ;;  %vm122_vm3 = vcmp.eq.s32.totalorder %v559_v25, %v548_v18  ;;  %p461_p4 = pnand %p460_p3, %p454_p0 }
  0x10   :  { %vm57_vm4 = vcmp.eq.s32.totalorder %v557_v24, %v37_v26  ;;  %vm125_vm5 = vcmp.eq.s32.totalorder %v559_v25, %v37_v26  ;;  %v397_v30 = vsel %vm56_vm0, 1.0, %v478_v29  ;;  %v413_v31 = vsel %vm124_vm1, 1.0, %v478_v29 }
  0x11   :  { %v395_v32 = vsel %vm54_vm2, 1.0, %v478_v29  ;;  %v411_v33 = vsel %vm122_vm3, 1.0, %v478_v29  ;;  %vm192_vm6 = vcmp.eq.s32.totalorder %v562_v27, %v36_v23  ;;  %vm190_vm7 = vcmp.eq.s32.totalorder %v562_v27, %v548_v18 }
  0x12   :  { %301 = vperm.xlu1 %448, %v26_v9   ;;  %296 = vperm.xlu0 %447, %v25_v10   ;;  %v398_v34 = vsel %vm57_vm4, 1.0, %v478_v29  ;;  %v414_v35 = vsel %vm125_vm5, 1.0, %v478_v29  ;;  %vm193_vm8 = vcmp.eq.s32.totalorder %v562_v27, %v37_v26  ;;  %v172_v37 = vadd.f32 %v413_v31, %v397_v30 }
  0x13   :  { %v170_v38 = vadd.f32 %v411_v33, %v395_v32  ;;  %vm55_vm9 = vcmp.eq.s32.totalorder %v557_v24, %v35_v28  ;;  %vm123_vm10 = vcmp.eq.s32.totalorder %v559_v25, %v35_v28  ;;  %v429_v39 = vsel %vm192_vm6, 1.0, %v478_v29 }
  0x14   :  { %v427_v40 = vsel %vm190_vm7, 1.0, %v478_v29  ;;  %v173_v43 = vadd.f32 %v414_v35, %v398_v34  ;;  %v430_v44 = vsel %vm193_vm8, 1.0, %v478_v29  ;;  %v396_v46 = vsel %vm55_vm9, 1.0, %v478_v29 }
  0x15   :  { %v412_v47 = vsel %vm123_vm10, 1.0, %v478_v29  ;;  %vm191_vm11 = vcmp.eq.s32.totalorder %v562_v27, %v35_v28  ;;  %vm59_vm12 = vcmp.eq.s32.totalorder %v557_v24, %v39_v36  ;;  %v240_v48 = vadd.f32 %v429_v39, %v172_v37 }
  0x16   :  { %311 = vperm.xlu1 %448, %v28_v11   ;;  %306 = vperm.xlu0 %447, %v27_v12   ;;  %v238_v49 = vadd.f32 %v427_v40, %v170_v38  ;;  %vm127_vm13 = vcmp.eq.s32.totalorder %v559_v25, %v39_v36  ;;  %vm58_vm14 = vcmp.eq.s32.totalorder %v557_v24, %v38_v41  ;;  %v428_v52 = vsel %vm191_vm11, 1.0, %v478_v29 }
  0x17   :  { %vm126_vm15 = vcmp.eq.s32.totalorder %v559_v25, %v38_v41  ;;  %vm61_vm0 = vcmp.eq.s32.totalorder %v557_v24, %v41_v42  ;;  %vm129_vm1 = vcmp.eq.s32.totalorder %v559_v25, %v41_v42  ;;  %v241_v50 = vadd.f32 %v430_v44, %v173_v43 }
  0x18   :  { %v171_v51 = vadd.f32 %v412_v47, %v396_v46  ;;  %v400_v53 = vsel %vm59_vm12, 1.0, %v478_v29  ;;  %v416_v54 = vsel %vm127_vm13, 1.0, %v478_v29  ;;  %vm60_vm2 = vcmp.eq.s32.totalorder %v557_v24, %v40_v45 }
  0x19   :  { %vm128_vm3 = vcmp.eq.s32.totalorder %v559_v25, %v40_v45  ;;  %v399_v56 = vsel %vm58_vm14, 1.0, %v478_v29  ;;  %v415_v57 = vsel %vm126_vm15, 1.0, %v478_v29  ;;  %v402_v58 = vsel %vm61_vm0, 1.0, %v478_v29 }
  0x1a   :  { %321 = vperm.xlu1 %448, %v30_v13   ;;  %316 = vperm.xlu0 %447, %v29_v14   ;;  %v418_v59 = vsel %vm129_vm1, 1.0, %v478_v29  ;;  %vm195_vm4 = vcmp.eq.s32.totalorder %v562_v27, %v39_v36  ;;  %vm194_vm5 = vcmp.eq.s32.totalorder %v562_v27, %v38_v41  ;;  %vm197_vm6 = vcmp.eq.s32.totalorder %v562_v27, %v41_v42 }
  0x1b   :  { %v175_v61 = vadd.f32 %v416_v54, %v400_v53  ;;  %v401_v62 = vsel %vm60_vm2, 1.0, %v478_v29  ;;  %v417_v63 = vsel %vm128_vm3, 1.0, %v478_v29  ;;  %vm196_vm7 = vcmp.eq.s32.totalorder %v562_v27, %v40_v45 }
  0x1c   :  { %v174_v2 = vadd.f32 %v415_v57, %v399_v56  ;;  %v177_v3 = vadd.f32 %v418_v59, %v402_v58  ;;  %vm63_vm8 = vcmp.eq.s32.totalorder %v557_v24, %v43_v55  ;;  %vm131_vm9 = vcmp.eq.s32.totalorder %v559_v25, %v43_v55 }
  0x1d   :  { %v239_v4 = vadd.f32 %v428_v52, %v171_v51  ;;  %v432_v5 = vsel %vm195_vm4, 1.0, %v478_v29  ;;  %v431_v6 = vsel %vm194_vm5, 1.0, %v478_v29  ;;  %v434_v7 = vsel %vm197_vm6, 1.0, %v478_v29 }
  0x1e   :  { %331 = vperm.xlu1 %448, %v32_v15   ;;  %326 = vperm.xlu0 %447, %v31_v16   ;;  %v176_v8 = vadd.f32 %v417_v63, %v401_v62  ;;  %v433_v9 = vsel %vm196_vm7, 1.0, %v478_v29  ;;  %vm62_vm10 = vcmp.eq.s32.totalorder %v557_v24, %v42_v60  ;;  %vm130_vm11 = vcmp.eq.s32.totalorder %v559_v25, %v42_v60 }
  0x1f   :  { %v404_v10 = vsel %vm63_vm8, 1.0, %v478_v29  ;;  %v420_v11 = vsel %vm131_vm9, 1.0, %v478_v29  ;;  %vm199_vm12 = vcmp.eq.s32.totalorder %v562_v27, %v43_v55  ;;  %v45_v12 = vadd.s32 88, %v548_v18 }
  0x20   :  { %v243_v15 = vadd.f32 %v432_v5, %v175_v61  ;;  %v242_v16 = vadd.f32 %v431_v6, %v174_v2  ;;  %v245_v17 = vadd.f32 %v434_v7, %v177_v3  ;;  %v44_v19 = vadd.s32 80, %v548_v18 }
  0x21   :  { %v403_v22 = vsel %vm62_vm10, 1.0, %v478_v29  ;;  %v419_v23 = vsel %vm130_vm11, 1.0, %v478_v29  ;;  %v244_v26 = vadd.f32 %v433_v9, %v176_v8  ;;  %v179_v28 = vadd.f32 %v420_v11, %v404_v10 }
  0x22   :  { %v436_v30 = vsel %vm199_vm12, 1.0, %v478_v29  ;;  %vm198_vm13 = vcmp.eq.s32.totalorder %v562_v27, %v42_v60  ;;  %vm65_vm14 = vcmp.eq.s32.totalorder %v557_v24, %v45_v12  ;;  %vm133_vm15 = vcmp.eq.s32.totalorder %v559_v25, %v45_v12 }
  0x23   :  { %v178_v35 = vadd.f32 %v419_v23, %v403_v22  ;;  %vm64_vm0 = vcmp.eq.s32.totalorder %v557_v24, %v44_v19  ;;  %vm132_vm1 = vcmp.eq.s32.totalorder %v559_v25, %v44_v19  ;;  %v47_v36 = vadd.s32 104, %v548_v18 }
  0x24   :  { %v435_v39 = vsel %vm198_vm13, 1.0, %v478_v29  ;;  %v46_v40 = vadd.s32 96, %v548_v18  ;;  %v247_v41 = vadd.f32 %v436_v30, %v179_v28  ;;  %v406_v42 = vsel %vm65_vm14, 1.0, %v478_v29 }
  0x25   :  { %v422_v43 = vsel %vm133_vm15, 1.0, %v478_v29  ;;  %vm201_vm2 = vcmp.eq.s32.totalorder %v562_v27, %v45_v12  ;;  %v405_v46 = vsel %vm64_vm0, 1.0, %v478_v29  ;;  %v421_v47 = vsel %vm132_vm1, 1.0, %v478_v29 }
  0x26   :  { %vm200_vm3 = vcmp.eq.s32.totalorder %v562_v27, %v44_v19  ;;  %vm67_vm4 = vcmp.eq.s32.totalorder %v557_v24, %v47_v36  ;;  %v48_v51 = vadd.s32 112, %v548_v18  ;;  %vm66_vm5 = vcmp.eq.s32.totalorder %v557_v24, %v46_v40 }
  0x27   :  { %vm134_vm6 = vcmp.eq.s32.totalorder %v559_v25, %v46_v40  ;;  %v181_v54 = vadd.f32 %v422_v43, %v406_v42  ;;  %v438_v55 = vsel %vm201_vm2, 1.0, %v478_v29  ;;  %v180_v56 = vadd.f32 %v421_v47, %v405_v46 }
  0x28   :  { %v49_v57 = vadd.s32 120, %v548_v18  ;;  %v437_v60 = vsel %vm200_vm3, 1.0, %v478_v29  ;;  %vm135_vm7 = vcmp.eq.s32.totalorder %v559_v25, %v47_v36  ;;  %v408_v63 = vsel %vm67_vm4, 1.0, %v478_v29 }
  0x29   :  { %vm202_vm8 = vcmp.eq.s32.totalorder %v562_v27, %v46_v40  ;;  %vm68_vm9 = vcmp.eq.s32.totalorder %v557_v24, %v48_v51  ;;  %vm136_vm10 = vcmp.eq.s32.totalorder %v559_v25, %v48_v51  ;;  %v248_v3 = vadd.f32 %v437_v60, %v180_v56 }
  0x2a   :  { %vm203_vm11 = vcmp.eq.s32.totalorder %v562_v27, %v47_v36  ;;  %vm69_vm12 = vcmp.eq.s32.totalorder %v557_v24, %v49_v57  ;;  %vm137_vm13 = vcmp.eq.s32.totalorder %v559_v25, %v49_v57  ;;  %v249_v9 = vadd.f32 %v438_v55, %v181_v54 }
  0x2b   :  { %v439_v11 = vsel %vm202_vm8, 1.0, %v478_v29  ;;  %v409_v12 = vsel %vm68_vm9, 1.0, %v478_v29  ;;  %vm204_vm14 = vcmp.eq.s32.totalorder %v562_v27, %v48_v51  ;;  %v440_v25 = vsel %vm203_vm11, 1.0, %v478_v29 }
  0x2c   :  { %v426_v19 = vsel %vm137_vm13, 1.0, %v478_v29  ;;  %vm205_vm15 = vcmp.eq.s32.totalorder %v562_v27, %v49_v57  ;;  %v441_v30 = vsel %vm204_vm14, 1.0, %v478_v29 }
  0x81   :  { %v267_v0 = vpop.permute.xlu1 %266  ;;  %v257_v1 = vpop.permute.xlu0 %256 }
  0x82   :  { %v334_v20 = vmul.f32 %v257_v1, %v238_v49  ;;  %v336_v31 = vmul.f32 %v267_v0, %v240_v48  ;;  %v407_v0 = vsel %vm66_vm5, 1.0, %v478_v29  ;;  %v423_v1 = vsel %vm134_vm6, 1.0, %v478_v29 }
  0x83   :  { %v182_v7 = vadd.f32 %v423_v1, %v407_v0 }
  0x85   :  { %v272_v13 = vpop.permute.xlu1 %271  ;;  %v262_v14 = vpop.permute.xlu0 %261  ;;  %v250_v22 = vadd.f32 %v439_v11, %v182_v7 }
  0x86   :  { %v335_v21 = vmul.f32 %v262_v14, %v239_v4  ;;  %v337_v37 = vmul.f32 %v272_v13, %v241_v50  ;;  %v246_v50 = vadd.f32 %v435_v39, %v178_v35  ;;  %v424_v4 = vsel %vm135_vm7, 1.0, %v478_v29 }
  0x87   :  { %v425_v13 = vsel %vm136_vm10, 1.0, %v478_v29  ;;  %v442_v35 = vsel %vm205_vm15, 1.0, %v478_v29 }
  0x88   :  { %v350_v32 = vadd.f32 %v335_v21, %v334_v20  ;;  %v184_v23 = vadd.f32 %v425_v13, %v409_v12 }
  0x89   :  { %v282_v33 = vpop.permute.xlu1 %281  ;;  %v277_v34 = vpop.permute.xlu0 %276 }
  0x8a   :  { %v351_v38 = vadd.f32 %v350_v32, %v336_v31  ;;  %v338_v44 = vmul.f32 %v277_v34, %v242_v16  ;;  %v339_v52 = vmul.f32 %v282_v33, %v243_v15  ;;  %v183_v16 = vadd.f32 %v424_v4, %v408_v63 }
  0x8c   :  { %v352_v45 = vadd.f32 %v351_v38, %v337_v37  ;;  %v251_v33 = vadd.f32 %v440_v25, %v183_v16  ;;  %v252_v37 = vadd.f32 %v441_v30, %v184_v23 }
  0x8d   :  { %v292_v48 = vpop.permute.xlu1 %291  ;;  %v287_v49 = vpop.permute.xlu0 %286 }
  0x8e   :  { %v353_v53 = vadd.f32 %v352_v45, %v338_v44  ;;  %v340_v58 = vmul.f32 %v287_v49, %v244_v26  ;;  %v341_v2 = vmul.f32 %v292_v48, %v245_v17  ;;  %v410_v17 = vsel %vm69_vm12, 1.0, %v478_v29 }
  0x8f   :  { %v185_v34 = vadd.f32 %v426_v19, %v410_v17  ;;  %v372_v29 = vstv %s703_s2 }
  0x90   :  { %v354_v59 = vadd.f32 %v353_v53, %v339_v52 }
  0x91   :  { %v302_v61 = vpop.permute.xlu1 %301  ;;  %v297_v62 = vpop.permute.xlu0 %296  ;;  %v253_v40 = vadd.f32 %v442_v35, %v185_v34 }
  0x92   :  { %v355_v18 = vadd.f32 %v354_v59, %v340_v58  ;;  %v342_v5 = vmul.f32 %v297_v62, %v246_v50  ;;  %v343_v14 = vmul.f32 %v302_v61, %v247_v41 }
  0x94   :  { %v356_v6 = vadd.f32 %v355_v18, %v341_v2 }
  0x95   :  { %v312_v8 = vpop.permute.xlu1 %311  ;;  %v307_v10 = vpop.permute.xlu0 %306 }
  0x96   :  { %v357_v15 = vadd.f32 %v356_v6, %v342_v5  ;;  %v344_v20 = vmul.f32 %v307_v10, %v248_v3  ;;  %v345_v31 = vmul.f32 %v312_v8, %v249_v9 }
  0x98   :  { %v358_v21 = vadd.f32 %v357_v15, %v343_v14 }
  0x99   :  { %v322_v26 = vpop.permute.xlu1 %321  ;;  %v317_v28 = vpop.permute.xlu0 %316 }
  0x9a   :  { %v359_v32 = vadd.f32 %v358_v21, %v344_v20  ;;  %v346_v24 = vmul.f32 %v317_v28, %v250_v22  ;;  %v347_v39 = vmul.f32 %v322_v26, %v251_v33 }
  0x9c   :  { %v360_v36 = vadd.f32 %v359_v32, %v345_v31 }
  0x9d   :  { %v327_v38 = vpop.permute.xlu0 %326  ;;  %v332_v41 = vpop.permute.xlu1 %331 }
  0x9e   :  { %v361_v27 = vadd.f32 %v360_v36, %v346_v24  ;;  %v348_v42 = vmul.f32 %v327_v38, %v252_v37  ;;  %v349_v44 = vmul.f32 %v332_v41, %v253_v40 }
  0xa0   :  { %v362_v43 = vadd.f32 %v361_v27, %v347_v39 }
  0xa2   :  { %v363_v45 = vadd.f32 %v362_v43, %v348_v42 }
  0xa4   :  { %v364_v46 = vadd.f32 %v363_v45, %v349_v44 }
  0xa6   :  { %v365_v47 = vrot.slane %v364_v46, 4 }
  0xa8   :  { %v366_v48 = vadd.f32 %v365_v47, %v364_v46 }
  0xaa   :  { %v367_v49 = vrot.slane %v366_v48, 2 }
  0xac   :  { %v368_v50 = vadd.f32 %v367_v49, %v366_v48 }
  0xae   :  { %v369_v51 = vrot.slane %v368_v50, 1 }
  0xb0   :  { %v370_v52 = vadd.f32 %v369_v51, %v368_v50 }
  0xb2   :  { %v373_v53 = vadd.f32 %v372_v29, %v370_v52 }
  0xb4   :  { %v443_v54 = vmul.f32 -1.442695, %v373_v53 }
  0xb6   :  { %449 = vpow2.f32 %v443_v54 }
  0xc0   :  { %v450_v55 = vpop.eup %449 }
  0xc1   :  { %v377_v56 = vadd.f32 1.0, %v450_v55 }
  0xc3   :  { %451 = vrcp.f32 %v377_v56 }
  0xcd   :  { %v452_v57 = vpop.eup %451 }
  0xce   :  { %380 = vst [vmem:[#allocation3] sm:$0x1] %v452_v57 }
  0xcf   :  { %464 = shalt.err (!%p461_p4)
}
  0xd0   :  { %s465_s24 = scalar_lea.hbm %s704_s3, 16 }
  0xd1   :  { %p466_p5 = scmp.ne.s32.totalorder %s704_s3, %s465_s24  ;;  %p469_p6 = scmp.lt.u32.totalorder %s465_s24, %s704_s3 }
  0xd3   :  { %p471_p7 = pnand %p469_p6, %p466_p5 }
  0xd5   :  { %474 = shalt.err (!%p471_p7)
}
  0xd6   :  { %390 = dma.vmem_to_hbm [thread:$0]  %s388_s20, 16, %s704_s3, [#allocation4]  }
  0xd7   :  { %475 = dma.done.wait [#allocation4], 16  }
  0xd8   :  { %476 = vsyncadd [#allocation4], 4294967280 }
  0xd9   :  { %394 = vsyncpa [#allocation4], 1 }

</bundles_post_ra>
